<compile_context>
chip_gen: v6e
topology: v6e:2x2x1
jax: 0.10.0
libtpu: 0.0.40
codegen_flags: <defaults>
</compile_context>

<pallas_src>
import functools

import jax
import jax.numpy as jnp
from jax import lax
from jax.experimental import pallas as pl
from jax.experimental.pallas import tpu as pltpu


def autopad(k, p=None, d=1):
    """Pad to 'same' shape outputs (matches the PyTorch helper)."""
    if d > 1:
        k = d * (k - 1) + 1 if isinstance(k, int) else [d * (x - 1) + 1 for x in k]
    if p is None:
        p = k // 2 if isinstance(k, int) else [x // 2 for x in k]
    return p


def _round_up(a, b):
    return (a + b - 1) // b * b


def _prefer_wide_tc():
    """256-wide output tiles only pay off on 256-wide MXUs (v6e / v7x)."""
    try:
        kind = jax.devices()[0].device_kind.lower()
        return not any(v in kind for v in ("v2", "v3", "v4", "v5"))
    except Exception:
        return False


def _matmul_bias_silu_kernel(p_ref, w_ref, b_ref, o_ref, *, apply_act):
    """One output tile: (TP, K) @ (K, TC) + bias, then SiLU, stored as bf16.

    p_ref: (TP, K)  bf16 im2col patch rows (K is the full, unpadded extent)
    w_ref: (K, TC)  bf16 conv weights with the BN scale pre-folded
    b_ref: (1, TC)  f32 folded BN bias
    o_ref: (TP, TC) bf16 output tile (lane-dense: TC is a multiple of 128)
    """
    acc = jnp.dot(p_ref[...], w_ref[...], preferred_element_type=jnp.float32)
    y = acc + b_ref[...]
    if apply_act:
        # SiLU: y * sigmoid(y).  exp + approx reciprocal run on the EUP slot.
        y = y * pl.reciprocal(1.0 + jnp.exp(-y), approx=True)
    o_ref[...] = y.astype(o_ref.dtype)


def conv_bn_silu(x_nhwc, weight, gamma, beta, running_mean, running_var, *,
                 stride=1, padding=0, dilation=1, act=True, eps=1e-5):
    """Conv2d(bias=False) + BatchNorm2d (inference, folded) + SiLU.

    Input is NHWC (bf16); returns NHWC bf16.
    """
    N, H, W, Cin = x_nhwc.shape
    Cout, Cin_w, KH, KW = weight.shape
    assert Cin_w == Cin, "groups != 1 not supported"

    Ho = (H + 2 * padding - dilation * (KH - 1) - 1) // stride + 1
    Wo = (W + 2 * padding - dilation * (KW - 1) - 1) // stride + 1
    P = N * Ho * Wo
    K = KH * KW * Cin

    # ---- glue: im2col with taps folded into K.  For k==1/s==1/p==0 (the
    # ultralytics Focus default) this is a free reshape: zero extra HBM copies.
    if KH == 1 and KW == 1 and stride == 1 and padding == 0:
        patches = x_nhwc.reshape(P, Cin)
    else:
        x_pad = jnp.pad(
            x_nhwc, ((0, 0), (padding, padding), (padding, padding), (0, 0)))
        cols = []
        for kh in range(KH):
            for kw in range(KW):
                h0, w0 = kh * dilation, kw * dilation
                xs = lax.slice(
                    x_pad,
                    (0, h0, w0, 0),
                    (N, h0 + (Ho - 1) * stride + 1, w0 + (Wo - 1) * stride + 1, Cin),
                    (1, stride, stride, 1),
                )
                cols.append(xs.reshape(P, Cin))
        patches = cols[0] if len(cols) == 1 else jnp.concatenate(cols, axis=1)
    patches = patches.astype(jnp.bfloat16)                                  # (P, K)

    # ---- fold inference BN: scale into the weights, bias stays in the epilogue
    scale = gamma.astype(jnp.float32) / jnp.sqrt(running_var.astype(jnp.float32) + eps)
    bias = beta.astype(jnp.float32) - running_mean.astype(jnp.float32) * scale

    w_slab = jnp.transpose(weight, (2, 3, 1, 0)).reshape(K, Cout).astype(jnp.float32)
    w_slab = w_slab * scale[None, :]

    # ---- tiling: K stays UNPADDED (full-extent blocks); Cout -> x128 lanes for
    # unmasked vst; P tiled with a ragged last block (Pallas masks OOB rows).
    Cp = _round_up(Cout, 128)
    TC = 256 if (_prefer_wide_tc() and Cp % 256 == 0) else 128

    if P >= 2048:
        TP = 1024
    elif P >= 1024:
        TP = 512
    elif P >= 128:
        TP = _round_up(-(-P // 2), 8)   # >= 2 P blocks so both v7x cores get work
    else:
        TP = P                          # single full-extent block

    w_slab = jnp.pad(w_slab, ((0, 0), (0, Cp - Cout))).astype(jnp.bfloat16)  # (K, Cp)
    bias_p = jnp.pad(bias, (0, Cp - Cout)).reshape(1, Cp)                    # (1, Cp) f32

    grid = (pl.cdiv(P, TP), Cp // TC)

    # Double-buffered in/out tiles (bf16) + bias; lifts v5e's 16 MiB scoped
    # default, stays well under v7x's 64 MiB physical VMEM.
    vmem_need = 2 * (TP * K * 2 + K * TC * 2 + TC * 4 + TP * TC * 2) + (2 << 20)
    vmem_limit = int(min(48 << 20, max(32 << 20, vmem_need)))

    cost = pl.CostEstimate(
        flops=2 * P * K * Cp,
        transcendentals=P * Cp if act else 0,
        # Patch tiles are DMA'd once (their block index is constant across the
        # inner j axis); weight/bias tiles are re-fetched once per P block.
        bytes_accessed=(patches.size * 2
                        + w_slab.size * 2 * grid[0]
                        + bias_p.size * 4 * grid[0]
                        + P * Cp * 2),
    )

    kernel = functools.partial(_matmul_bias_silu_kernel, apply_act=act)
    out_flat = pl.pallas_call(
        kernel,
        out_shape=jax.ShapeDtypeStruct((P, Cp), jnp.bfloat16),
        grid=grid,
        in_specs=[
            # TODO(synk): sweep pipeline_mode=pl.Buffered(3) on patches for v5e.
            pl.BlockSpec((TP, K), lambda i, j: (i, 0)),
            pl.BlockSpec((K, TC), lambda i, j: (0, j)),
            pl.BlockSpec((1, TC), lambda i, j: (0, j)),
        ],
        out_specs=pl.BlockSpec((TP, TC), lambda i, j: (i, j)),
        compiler_params=pltpu.CompilerParams(
            dimension_semantics=("parallel", "parallel"),
            vmem_limit_bytes=vmem_limit,
        ),
        cost_estimate=cost,
    )(patches, w_slab, bias_p)

    return out_flat[:, :Cout].reshape(N, Ho, Wo, Cout)


def focus_forward(x, weight, gamma, beta, running_mean, running_var, *,
                  k=1, s=1, p=None, d=1, act=True, eps=1e-5):
    """Focus: 2x2 space-to-depth, then Conv(4*c1, c2, k, s) + BN + SiLU.

    Returns NCHW bf16 (matches the module's layout; dtype narrowed to bf16).
    """
    N, C, H, W = x.shape
    # Space-to-depth as ONE reshape/transpose from NCHW.  The flattened channel
    # order (w-parity, h-parity, c) matches
    #   torch.cat((x[...,::2,::2], x[...,1::2,::2], x[...,::2,1::2], x[...,1::2,1::2]), 1)
    # so the conv weights are consumed unpermuted.
    xs = x.astype(jnp.bfloat16).reshape(N, C, H // 2, 2, W // 2, 2)
    xs = jnp.transpose(xs, (0, 2, 4, 5, 3, 1)).reshape(N, H // 2, W // 2, 4 * C)
    out_nhwc = conv_bn_silu(
        xs, weight, gamma, beta, running_mean, running_var,
        stride=s, padding=autopad(k, p, d), dilation=d, act=act, eps=eps,
    )
    # TODO(synk): returning NHWC would save this extra HBM pass; NCHW kept to
    # match the PyTorch module's output layout.
    return jnp.transpose(out_nhwc, (0, 3, 1, 2))


def _reference(x, weight, gamma, beta, mean, var, *, k, s, p=None, d=1, eps=1e-5):
    xf = jnp.concatenate(
        [x[:, :, ::2, ::2], x[:, :, 1::2, ::2], x[:, :, ::2, 1::2], x[:, :, 1::2, 1::2]],
        axis=1,
    ).astype(jnp.float32)
    pad = autopad(k, p, d)
    y = lax.conv_general_dilated(
        xf, weight.astype(jnp.float32),
        window_strides=(s, s),
        padding=((pad, pad), (pad, pad)),
        rhs_dilation=(d, d),
        dimension_numbers=("NCHW", "OIHW", "NCHW"),
    )
    scale = gamma / jnp.sqrt(var + eps)
    bias = beta - mean * scale
    y = y * scale.reshape(1, -1, 1, 1) + bias.reshape(1, -1, 1, 1)
    return y * jax.nn.sigmoid(y)   # SiLU


if __name__ == "__main__":
    # Focus(c1=4, c2=8): x (2,4,16,16) -> space-to-depth (2,16,8,8) -> (2,8,8,8)
    N, C1, H, W = 2, 4, 16, 16
    C2 = 8
    Cin_conv = 4 * C1

    key = jax.random.PRNGKey(0)
    kx, kg, kb, km, kv, kw1, kw3 = jax.random.split(key, 7)

    x = jax.random.normal(kx, (N, C1, H, W), dtype=jnp.float32)
    gamma = 1.0 + 0.1 * jax.random.normal(kg, (C2,), dtype=jnp.float32)
    beta = 0.1 * jax.random.normal(kb, (C2,), dtype=jnp.float32)
    running_mean = 0.1 * jax.random.normal(km, (C2,), dtype=jnp.float32)
    running_var = jnp.abs(jax.random.normal(kv, (C2,), dtype=jnp.float32)) + 0.5

    # Exercise both the zero-copy k=1 path (ultralytics default) and the
    # im2col k=3 path.
    for k, wkey in ((1, kw1), (3, kw3)):
        fan_in = Cin_conv * k * k
        weight = jax.random.normal(
            wkey, (C2, Cin_conv, k, k), dtype=jnp.float32) * (fan_in ** -0.5)

        out = focus_forward(x, weight, gamma, beta, running_mean, running_var, k=k, s=1)
        out = jax.block_until_ready(out)

        ref = _reference(x, weight, gamma, beta, running_mean, running_var, k=k, s=1)
        assert out.shape == (N, C2, H // 2, W // 2), out.shape
        out_f32 = out.astype(jnp.float32)
        max_err = float(jnp.max(jnp.abs(out_f32 - ref)))
        # bf16 inputs/weights/output with f32 accumulation -> loosened tolerance.
        assert jnp.allclose(out_f32, ref, atol=6e-2, rtol=6e-2), (k, max_err)

    print("KERNEL_OK")
</pallas_src>

<mosaic_0001>
module attributes {stable_mosaic.version = 11 : i64} {
  func.func @_matmul_bias_silu_kernel(%arg0: i32, %arg1: i32, %arg2: memref<64x16xbf16, #tpu.memory_space<vmem>>, %arg3: memref<16x128xbf16, #tpu.memory_space<vmem>>, %arg4: memref<1x128xf32, #tpu.memory_space<vmem>>, %arg5: memref<64x128xbf16, #tpu.memory_space<vmem>>) attributes {dimension_semantics = [#tpu.dimension_semantics<parallel>, #tpu.dimension_semantics<parallel>], iteration_bounds = array<i64: 2, 1>, scalar_prefetch = 0 : i64, scratch_operands = 0 : i64, tpu.core_type = #tpu.core_type<tc>, window_params = [{transform_indices = @transform_0, window_bounds = array<i64: 64, 16>}, {transform_indices = @transform_1, window_bounds = array<i64: 16, 128>}, {transform_indices = @transform_2, window_bounds = array<i64: 1, 128>}, {transform_indices = @transform_3, window_bounds = array<i64: 64, 128>}]} {
    %c0 = arith.constant 0 : index
    %c0_0 = arith.constant 0 : index
    %0 = vector.load %arg2[%c0, %c0_0] : memref<64x16xbf16, #tpu.memory_space<vmem>>, vector<64x16xbf16>
    %c0_1 = arith.constant 0 : index
    %c0_2 = arith.constant 0 : index
    %1 = vector.load %arg3[%c0_1, %c0_2] : memref<16x128xbf16, #tpu.memory_space<vmem>>, vector<16x128xbf16>
    %cst = arith.constant dense<0.000000e+00> : vector<64x128xf32>
    %2 = tpu.matmul %0, %1, %cst {dimension_numbers = #tpu.dot_dimension_numbers<[1], [0], [0], [1], [0, 0, 1, 1], [], []>} : vector<64x16xbf16>, vector<16x128xbf16>, vector<64x128xf32> -> vector<64x128xf32>
    %c0_3 = arith.constant 0 : index
    %c0_4 = arith.constant 0 : index
    %3 = vector.load %arg4[%c0_3, %c0_4] : memref<1x128xf32, #tpu.memory_space<vmem>>, vector<1x128xf32>
    %4 = vector.broadcast %3 : vector<1x128xf32> to vector<64x128xf32>
    %5 = arith.addf %2, %4 : vector<64x128xf32>
    %cst_5 = arith.constant 0.000000e+00 : f32
    %6 = vector.broadcast %cst_5 : f32 to vector<64x128xf32>
    %7 = arith.subf %6, %5 : vector<64x128xf32>
    %8 = math.exp %7 : vector<64x128xf32>
    %cst_6 = arith.constant 1.000000e+00 : f32
    %9 = vector.broadcast %cst_6 : f32 to vector<64x128xf32>
    %10 = arith.addf %9, %8 : vector<64x128xf32>
    %11 = tpu.reciprocal %10 {approx = true} : vector<64x128xf32> -> vector<64x128xf32>
    %12 = arith.mulf %5, %11 : vector<64x128xf32>
    %13 = arith.truncf %12 : vector<64x128xf32> to vector<64x128xbf16>
    %c0_7 = arith.constant 0 : index
    %c0_8 = arith.constant 0 : index
    %14 = vector.load %arg5[%c0_7, %c0_8] : memref<64x128xbf16, #tpu.memory_space<vmem>>, vector<64x128xbf16>
    tpu.vector_store %arg5[%c0_7, %c0_8], %13 {strides = array<i32>} : memref<64x128xbf16, #tpu.memory_space<vmem>>, vector<64x128xbf16>,
    return
  }
  func.func @transform_0(%arg0: i32, %arg1: i32) -> (i32, i32) {
    %c0_i32 = arith.constant 0 : i32
    %c0_i32_0 = arith.constant 0 : i32
    return %arg0, %c0_i32 : i32, i32
  }
  func.func @transform_1(%arg0: i32, %arg1: i32) -> (i32, i32) {
    %c0_i32 = arith.constant 0 : i32
    %c0_i32_0 = arith.constant 0 : i32
    return %c0_i32, %arg1 : i32, i32
  }
  func.func @transform_2(%arg0: i32, %arg1: i32) -> (i32, i32) {
    %c0_i32 = arith.constant 0 : i32
    %c0_i32_0 = arith.constant 0 : i32
    return %c0_i32, %arg1 : i32, i32
  }
  func.func @transform_3(%arg0: i32, %arg1: i32) -> (i32, i32) {
    %c0_i32 = arith.constant 0 : i32
    return %arg0, %arg1 : i32, i32
  }
}

</mosaic_0001>

<bundles_post_ra>
// kernel: tpu_custom_call.1
= control target key start
LH: loop header
LB: loop body
LE: loop exit
PB: predicated region body
PF: predicated region fallthrough
CT: control target
= control target key end

     0   :  { %8 = vsyncpa [#allocation3], 0  ;;  %s957_s0 = inlined_call_operand.vmem [shape: bf16[128,16], index: 0, kind: input, shape index: {}]   ;;  %s958_s1 = inlined_call_operand.vmem [shape: bf16[16,128], index: 1, kind: input, shape index: {}]   ;;  %s959_s2 = inlined_call_operand.vmem [shape: f32[1,128], index: 2, kind: input, shape index: {}]   ;;  %s960_s3 = inlined_call_operand.hbm [shape: bf16[128,128], index: 3, kind: output, shape index: {}]  }
   0x1   :  { %10 = vsyncpa [#allocation3 + $0x1], 0  ;;  %s818_s12 = smov 0   ;;  %s820_s13 = smov 0  }
   0x2   :  { %s822_s14 = smov 0   ;;  %s824_s15 = smov 0  }
   0x3   :  { %s826_s16 = smov 0   ;;  %s828_s17 = smov 0  }
   0x4 LB: > { %s541_s18 = sadd.s32 4294967295, %s793_s17   ;;  %s542_s19 = sadd.s32 4294967294, %s793_s17   ;;  %s793_s17 = sphi %s828_s17, %s16_s17   ;;  %s789_s16 = sphi %s826_s16, %s967_s16   ;;  %s785_s15 = sphi %s824_s15, %s966_s15   ;;  %s781_s14 = sphi %s822_s14, %s965_s14   ;;  %s777_s13 = sphi %s820_s13, %s964_s13   ;;  %s773_s12 = sphi %s818_s12, %s963_s12  }
   0x5   : > { %s28_s20 = sadd.s32 1, %s789_s16  ;;  %s115_s21 = sadd.s32 1, %s781_s14 }
   0x6   : > { %p30_p0 = scmp.ge.s32.totalorder %s28_s20, 2  ;;  %p125_p1 = scmp.ne.s32.totalorder %s781_s14, %s777_s13 }
   0x7   : > { %p126_p2 = scmp.eq.s32.totalorder %s541_s18, 1  ;;  %p131_p3 = scmp.ne.s32.totalorder %s777_s13, %s773_s12 }
   0x8   : > { %s969_s20 = smov (%p30_p0, %s28_s20), 0  ;;  %p132_p5 = scmp.eq.s32.totalorder %s542_s19, 1 }
   0x9   : > { %p858_p4 = por %p126_p2, %p125_p1  ;;  %s110_s23 = ssub.s32 %s789_s16, %s969_s20 }
   0xa   : > { %p547_p6 = scmp.ge.s32.totalorder %s793_s17, 1  ;;  %p113_p7 = scmp.eq.s32.totalorder %s110_s23, 0 }
   0xb   : > { %p865_p8 = por %p132_p5, %p131_p3  ;;  %p172_p9 = scmp.lt.s32.totalorder %s793_s17, 3 }
   0xc   : > { %s871_s25 = scalar_select %p113_p7, %s781_s14, %s115_s21  }
   0xd   : > { %p173_p10 = pnand %p547_p6, %p172_p9 }
   0xe   : > { %s549_s28 = sshll.u32 (!%p173_p10), %s785_s15, 3  ;;  %s200_s8 = sand.u32 (!%p173_p10), 1, %s777_s13  }
   0xf   : > { %176 = sbr.rel (%p173_p10) target bundleno = 279 (0x117), region = 32  ;;  %p204_p11 = scmp.lt.s32.totalorder (!%p173_p10), %s549_s28, 15 }
  0x10   : > { %s548_s9 = sshll.u32 (!%p173_p10), %s200_s8, 5  ;;  %s582_s18 = sshll.u32 (!%p173_p10), %s785_s15, 9 }
  0x11   : > { %s202_s10 = scalar_lea.vmem (!%p173_p10), [#allocation2], %s548_s9  ;;  %s908_s21 = scalar_lea.hbm (!%p173_p10), %s960_s3, %s582_s18 }
  0x12   : > { %s442_s11 = sshll.u32 (!%p173_p10), %s202_s10, 4  ;;  %s912_s23 = scalar_lea.sflag (!%p173_p10), [#allocation3], %s200_s8  ;;  %s903_s11 = int_to_ptr.vmem [resolvable:$true] %s442_s11 }
  0x13   : > { %s717_s26 = scalar_lea.vmem (!%p173_p10), %s903_s11, 512  ;;  %s795_s27 = smov (!%p173_p10), [#allocation2]  }
  0x14   : > { %v680_v0 = vld [vmem:[%s958_s1] sm:$0xff]   ;;  %s971_s28 = smov (!%p204_p11, %s549_s28), 15  ;;  %vm261_vm0 = vcmask 130048   ;;  %p718_p12 = scmp.ne.s32.totalorder %s903_s11, %s717_s26 }
  0x15   : > { %611 = vmatprep.subr.bf16.mxu0 %v680_v0  ;;  %621 = vmatprep.subr.bf16.mxu1 %v680_v0  ;;  %s550_s29 = sshll.u32 %s971_s28, 2  ;;  %v551_v5 = vld [vmem:[%s959_s2] ss:$0 sm:$0xff]  ;;  %s721_s28 = sshll.u32 %s795_s27, 4  ;;  %s722_s28 = int_to_ptr.vmem [resolvable:$false] %s721_s28 }
  0x16   : > { %612 = vmatpush3.bf16.msra.mxu0 %v680_v0  ;;  %622 = vmatpush3.bf16.msra.mxu1 %v680_v0  ;;  %s207_s5 = scalar_lea.vmem %s957_s0, %s550_s29  ;;  %p719_p13 = pnand %p718_p12, %p858_p4 }
  0x17   : > { %v681_v1 = vld [vmem:[%s207_s5] sm:$0xff]   ;;  %v682_v2 = vld [vmem:[%s207_s5 + $0x10] sm:$0xff]   ;;  %v683_v3 = vld [vmem:[%s207_s5 + $0x8] sm:$0xff]   ;;  %s723_s29 = scalar_lea.vmem %s722_s28, 1024  ;;  %p724_p1 = scmp.lt.s32.totalorder %s903_s11, %s722_s28 }
  0x18   : > { %613 = vmatprep.mubr.msk.bf16.mxu0 %vm261_vm0, %v681_v1  ;;  %617 = vmatprep.mubr.msk.bf16.mxu1 %vm261_vm0, %v682_v2  ;;  %v684_v4 = vld [vmem:[%s207_s5 + $0x18] sm:$0xff]   ;;  %p720_p0 = pneg %p719_p13  ;;  %p725_p2 = scmp.lt.s32.totalorder %s723_s29, %s717_s26 }
  0x19   : > { %614 = vmatmul.mubr.msk.bf16.vlgmr.msra.gmra.mxu0 %vm261_vm0, %v683_v3  ;;  %618 = vmatmul.mubr.msk.bf16.vlgmr.msra.gmra.mxu1 %vm261_vm0, %v684_v4 }
  0x1a   : > { %p726_p3 = por %p725_p2, %p724_p1 }
  0x1c   : > { %p727_p5 = pnand %p726_p3, %p720_p0 }
  0xd9   : > { %v615_v6 = vpop.f32.mrf.mxu0  ;;  %v619_v8 = vpop.f32.mrf.mxu1 }
  0xda   : > { %v883_v7 = vadd.f32 %v615_v6, %v551_v5  ;;  %v885_v9 = vadd.f32 %v619_v8, %v551_v5 }
  0xdb   : > { %v308_v10 = vpop.f32.mrf.mxu0  ;;  %v324_v13 = vpop.f32.mrf.mxu1 }
  0xdc   : > { %v341_v11 = vsub.f32 0.0, %v883_v7  ;;  %v888_v12 = vadd.f32 %v551_v5, %v308_v10  ;;  %v345_v14 = vsub.f32 0.0, %v885_v9  ;;  %v891_v15 = vadd.f32 %v551_v5, %v324_v13 }
  0xdd   : > { %v616_v16 = vpop.f32.mrf.mxu0  ;;  %v620_v20 = vpop.f32.mrf.mxu1 }
  0xde   : > { %v351_v17 = vmul.f32 1.442695, %v341_v11  ;;  %v339_v18 = vsub.f32 0.0, %v888_v12  ;;  %v320_v19 = vadd.f32 %v616_v16, %v551_v5  ;;  %v359_v21 = vmul.f32 1.442695, %v345_v14 }
  0xdf   : > { %v343_v22 = vsub.f32 0.0, %v891_v15  ;;  %v336_v23 = vadd.f32 %v620_v20, %v551_v5  ;;  %v311_v24 = vpop.f32.mrf.mxu0  ;;  %v327_v28 = vpop.f32.mrf.mxu1 }
  0xe0   : > { %685 = vpow2.f32 %v351_v17  ;;  %v347_v25 = vmul.f32 1.442695, %v339_v18  ;;  %v342_v26 = vsub.f32 0.0, %v320_v19  ;;  %v312_v27 = vadd.f32 %v551_v5, %v311_v24 }
  0xe1   : > { %687 = vpow2.f32 %v359_v21  ;;  %v355_v29 = vmul.f32 1.442695, %v343_v22  ;;  %v346_v30 = vsub.f32 0.0, %v336_v23  ;;  %v328_v31 = vadd.f32 %v551_v5, %v327_v28 }
  0xe2   : > { %689 = vpow2.f32 %v347_v25  ;;  %v353_v32 = vmul.f32 1.442695, %v342_v26  ;;  %v340_v33 = vsub.f32 0.0, %v312_v27 }
  0xe3   : > { %691 = vpow2.f32 %v355_v29  ;;  %v361_v34 = vmul.f32 1.442695, %v346_v30  ;;  %v344_v35 = vsub.f32 0.0, %v328_v31 }
  0xe4   : > { %693 = vpow2.f32 %v353_v32  ;;  %v349_v36 = vmul.f32 1.442695, %v340_v33 }
  0xe5   : > { %695 = vpow2.f32 %v361_v34  ;;  %v357_v37 = vmul.f32 1.442695, %v344_v35 }
  0xe6   : > { %697 = vpow2.f32 %v349_v36 }
  0xe7   : > { %699 = vpow2.f32 %v357_v37 }
  0xed   : > { %v686_v38 = vpop.eup %685 }
  0xee   : > { %v688_v39 = vpop.eup %687  ;;  %v365_v40 = vadd.f32 1.0, %v686_v38 }
  0xef   : > { %v690_v41 = vpop.eup %689  ;;  %v369_v42 = vadd.f32 1.0, %v688_v39 }
  0xf0   : > { %v692_v43 = vpop.eup %691  ;;  %701 = vrcp.f32 %v365_v40  ;;  %v363_v44 = vadd.f32 1.0, %v690_v41 }
  0xf1   : > { %v694_v45 = vpop.eup %693  ;;  %703 = vrcp.f32 %v369_v42  ;;  %v367_v46 = vadd.f32 1.0, %v692_v43 }
  0xf2   : > { %v696_v47 = vpop.eup %695  ;;  %705 = vrcp.f32 %v363_v44  ;;  %v366_v48 = vadd.f32 1.0, %v694_v45 }
  0xf3   : > { %v698_v49 = vpop.eup %697  ;;  %707 = vrcp.f32 %v367_v46  ;;  %v370_v50 = vadd.f32 1.0, %v696_v47 }
  0xf4   : > { %v700_v51 = vpop.eup %699  ;;  %709 = vrcp.f32 %v366_v48  ;;  %v364_v52 = vadd.f32 1.0, %v698_v49 }
  0xf5   : > { %711 = vrcp.f32 %v370_v50  ;;  %v368_v53 = vadd.f32 1.0, %v700_v51 }
  0xf6   : > { %713 = vrcp.f32 %v364_v52 }
  0xf7   : > { %715 = vrcp.f32 %v368_v53 }
  0xfd   : > { %v702_v54 = vpop.eup %701 }
  0xfe   : > { %v704_v55 = vpop.eup %703  ;;  %v381_v60 = vmul.f32 %v702_v54, %v883_v7 }
  0xff   : > { %v706_v56 = vpop.eup %705  ;;  %v385_v63 = vmul.f32 %v704_v55, %v885_v9 }
 0x100   : > { %v708_v57 = vpop.eup %707  ;;  %v379_v2 = vmul.f32 %v706_v56, %v888_v12 }
 0x101   : > { %v710_v58 = vpop.eup %709  ;;  %v383_v5 = vmul.f32 %v708_v57, %v891_v15 }
 0x102   : > { %v712_v59 = vpop.eup %711  ;;  %v382_v61 = vmul.f32 %v710_v58, %v320_v19 }
 0x103   : > { %v714_v62 = vpop.eup %713  ;;  %v386_v0 = vmul.f32 %v712_v59, %v336_v23 }
 0x104   : > { %v716_v1 = vpop.eup %715  ;;  %v591_v3 = vpack.c.bf16 %v382_v61, %v381_v60  ;;  %v380_v4 = vmul.f32 %v714_v62, %v312_v27 }
 0x105   : > { %v601_v6 = vpack.c.bf16 %v386_v0, %v385_v63  ;;  %v384_v8 = vmul.f32 %v716_v1, %v328_v31 }
 0x106   : > { %603 = vst [vmem:[%s202_s10 + $0x8] sm:$0xff] %v591_v3   ;;  %v586_v7 = vpack.c.bf16 %v380_v4, %v379_v2 }
 0x107   : > { %605 = vst [vmem:[%s202_s10 + $0x18] sm:$0xff] %v601_v6   ;;  %v596_v9 = vpack.c.bf16 %v384_v8, %v383_v5 }
 0x108   : > { %587 = vst [vmem:[%s202_s10] sm:$0xff] %v586_v7  }
 0x109   : > { %604 = vst [vmem:[%s202_s10 + $0x10] sm:$0xff] %v596_v9  }
 0x10a   : > { %730 = shalt.err (!%p727_p5)
}
 0x10b   : > { %s731_s30 = scalar_lea.hbm %s908_s21, 512  ;;  %s735_s6 = scalar_lea.hbm %s960_s3, 1024 }
 0x10c   : > { %p732_p6 = scmp.ne.s32.totalorder %s908_s21, %s731_s30  ;;  %p736_p10 = scmp.lt.s32.totalorder %s908_s21, %s960_s3 }
 0x10d   : > { %p737_p11 = scmp.lt.s32.totalorder %s735_s6, %s731_s30 }
 0x10e   : > { %p733_p7 = pnand %p732_p6, %p858_p4 }
 0x10f   : > { %p738_p12 = por %p737_p11, %p736_p10 }
 0x110   : > { %p734_p9 = pneg %p733_p7 }
 0x112   : > { %p739_p13 = pnand %p738_p12, %p734_p9 }
 0x114   : > { %742 = shalt.err (!%p739_p13)
}
 0x115   : > { %s796_s9 = smov 64   ;;  %s797_s10 = smov 4  }
 0x116   : > { %623 = dma.vmem_to_hbm [thread:$0]  (%p858_p4), %s903_s11, 512, %s908_s21, %s912_s23, %s796_s9, %s796_s9, %s797_s10  }
 0x117 PF: > { %p629_p0 = scmp.ge.s32.totalorder %s793_s17, 2  ;;  %s457_s18 = sand.u32 1, %s773_s12  }
 0x118   : > { %s458_s19 = scalar_lea.sflag [#allocation3], %s457_s18 }
 0x119   : > { %p626_p1 = pnand %p629_p0, %p865_p8 }
 0x11b   : > { %p627_p2 = pneg %p626_p1 }
 0x11d   : > { %768 = dma.done.wait (%p627_p2), %s458_s19, 512  }
 0x11e   : > { %770 = vsyncadd (%p627_p2), %s458_s19, 4294966784  ;;  %s16_s17 = sadd.s32 1, %s793_s17   ;;  %s963_s12 = smov %s777_s13 }
 0x11f   : > { %p13_p3 = scmp.ge.s32.totalorder %s16_s17, 4   ;;  %s964_s13 = smov %s781_s14 }
 0x120   : > { %s965_s14 = smov %s871_s25  ;;  %s966_s15 = smov %s789_s16 }
 0x121   : > { %s967_s16 = smov %s969_s20  ;;  %15 = sbr.rel (!%p13_p3) target bundleno = 4 (0x4), region = 73 }
 0x126   :  { %463 = vsyncpa [#allocation3], 1 }
 0x127   :  { %465 = vsyncpa [#allocation3 + $0x1], 1 }

</bundles_post_ra>
